<compile_context>
chip_gen: v5e
topology: v5e:2x2
jax: 0.10.0
libtpu: 0.0.40
codegen_flags: <defaults>
</compile_context>

<pallas_src>
import functools

import jax
import jax.numpy as jnp
from jax import lax
from jax.experimental import pallas as pl
from jax.experimental.pallas import tpu as pltpu

LANE = 128            # lane width of a vreg
SUBLANE = 8           # sublane count of a vreg
MAX_BLOCK_ROWS = 256  # row tile for the GEMM grid
USE_BF16_MATMUL = True  # bf16 MXU operands, f32 accumulation (per review)


def _round_up(x, m):
    return (x + m - 1) // m * m


def _pad_to(x, shape):
    return jnp.pad(x, [(0, s - d) for d, s in zip(x.shape, shape)])


def _pad_spatial(x, pad, pad_type):
    if pad == 0:
        return x
    cfg = ((0, 0), (pad, pad), (pad, pad), (0, 0))
    if pad_type == "reflect":
        return jnp.pad(x, cfg, mode="reflect")   # == nn.ReflectionPad2d
    return jnp.pad(x, cfg)                       # 'zero' -> nn.ZeroPad2d


def _extract_patches(x, kh, kw, stride):
    """x: spatially padded NHWC -> (B*OH*OW, KH*KW*C) im2col matrix."""
    B, Hp, Wp, C = x.shape
    OH = (Hp - kh) // stride + 1
    OW = (Wp - kw) // stride + 1
    cols = []
    for i in range(kh):
        for j in range(kw):
            cols.append(lax.slice(
                x,
                (0, i, j, 0),
                (B, i + stride * (OH - 1) + 1, j + stride * (OW - 1) + 1, C),
                (1, stride, stride, 1)))
    patches = jnp.concatenate(cols, axis=-1)          # (B, OH, OW, KH*KW*C)
    return patches.reshape(B * OH * OW, kh * kw * C), OH, OW


# -----------------------------------------------------------------------------
# Pallas kernels
# -----------------------------------------------------------------------------

def _gemm_bias_act_kernel(x_ref, w_ref, b_ref, o_ref, *, apply_relu, use_bf16):
    """One fused tile: o = [relu](x @ W + b); bf16 MXU operands, f32 accumulate."""
    op_dtype = jnp.bfloat16 if use_bf16 else jnp.float32
    x = x_ref[...].astype(op_dtype)
    w = w_ref[...].astype(op_dtype)
    acc = jnp.dot(x, w, preferred_element_type=jnp.float32)   # MXU
    acc = acc + b_ref[...].astype(jnp.float32)                # (1, N) broadcast, f32 VPU
    if apply_relu:
        acc = jnp.maximum(acc, 0.0)
    o_ref[...] = acc.astype(o_ref.dtype)                      # lane-dense store


def _fused_gemm(x, w, b, *, apply_relu, block_rows):
    """x: (Rp, Kp), w: (Kp, Np), b: (1, Np); all pre-padded to (8,128) multiples."""
    Rp, Kp = x.shape
    _, Np = w.shape
    grid = (Rp // block_rows,)
    kernel = functools.partial(
        _gemm_bias_act_kernel, apply_relu=apply_relu, use_bf16=USE_BF16_MATMUL)
    return pl.pallas_call(
        kernel,
        out_shape=jax.ShapeDtypeStruct((Rp, Np), jnp.float32),
        grid_spec=pltpu.PrefetchScalarGridSpec(
            num_scalar_prefetch=0,
            grid=grid,
            in_specs=[
                pl.BlockSpec((block_rows, Kp), lambda i: (i, 0)),  # activations: row-tiled
                pl.BlockSpec((Kp, Np), lambda i: (0, 0)),          # weights: VMEM-resident
                pl.BlockSpec((1, Np), lambda i: (0, 0)),           # bias:    VMEM-resident
            ],
            out_specs=pl.BlockSpec((block_rows, Np), lambda i: (i, 0)),
        ),
        compiler_params=pltpu.CompilerParams(
            dimension_semantics=("parallel",),   # shard row tiles across TCs (v7x)
        ),
    )(x, w, b)


def _pool_head_kernel(x_ref, w_ref, b_ref, o_ref, *, inv_hw, use_bf16):
    """Fused AdaptiveAvgPool2d(1) + 1x1 conv: o = mean_hw(x) @ W + b."""
    x = x_ref[...].astype(jnp.float32)                 # (Bp, HW, Cp)
    pooled = jnp.sum(x, axis=1) * inv_hw               # (Bp, Cp), XLU reduce
    op_dtype = jnp.bfloat16 if use_bf16 else jnp.float32
    y = jnp.dot(pooled.astype(op_dtype), w_ref[...].astype(op_dtype),
                preferred_element_type=jnp.float32)
    y = y + b_ref[...].astype(jnp.float32)
    o_ref[...] = y.astype(o_ref.dtype)


def _pool_head(x, w, b):
    """x: (B, HW, C) exact; w: (C, style_dim); b: (style_dim,)."""
    B, HW, C = x.shape
    S = w.shape[1]
    Cp = _round_up(C, LANE)
    Sp = _round_up(S, LANE)
    Bp = _round_up(max(B, SUBLANE), SUBLANE)           # sublane-pad the batch
    xp = _pad_to(x, (Bp, HW, Cp))
    wp = _pad_to(w, (Cp, Sp))
    bp = _pad_to(b.reshape(1, -1), (1, Sp))
    kernel = functools.partial(_pool_head_kernel, inv_hw=1.0 / HW,
                               use_bf16=USE_BF16_MATMUL)
    out = pl.pallas_call(
        kernel,
        out_shape=jax.ShapeDtypeStruct((Bp, Sp), jnp.float32),
        in_specs=[pl.BlockSpec(memory_space=pltpu.MemorySpace.VMEM)] * 3,
        out_specs=pl.BlockSpec(memory_space=pltpu.MemorySpace.VMEM),
    )(xp, wp, bp)
    return out[:B, :S]


# -----------------------------------------------------------------------------
# Layer wrappers (layout plumbing only)
# -----------------------------------------------------------------------------

def _conv_block(x, w, b, *, stride, pad, pad_type, apply_relu):
    """Conv2dBlock (norm='none'): pad -> conv -> [relu].  x NHWC, w HWIO."""
    B, H, W_, Cin = x.shape
    KH, KW, _, Cout = w.shape
    xp = _pad_spatial(x, pad, pad_type)
    patches, OH, OW = _extract_patches(xp, KH, KW, stride)   # (B*OH*OW, KH*KW*Cin)
    R, K = patches.shape
    Kp = _round_up(K, LANE)
    Np = _round_up(Cout, LANE)
    block_rows = min(MAX_BLOCK_ROWS, _round_up(R, SUBLANE))
    Rp = pl.cdiv(R, block_rows) * block_rows
    xg = _pad_to(patches, (Rp, Kp))
    wg = _pad_to(w.reshape(KH * KW * Cin, Cout), (Kp, Np))
    bg = _pad_to(b.reshape(1, -1), (1, Np))
    y = _fused_gemm(xg, wg, bg, apply_relu=apply_relu, block_rows=block_rows)
    return y[:R, :Cout].reshape(B, OH, OW, Cout)


def init_style_encoder_params(key, n_downsample, input_dim, dim, style_dim,
                              dtype=jnp.float32):
    """Conv weights stored HWIO; init mirrors nn.Conv2d default (uniform +/- 1/sqrt(fan_in))."""
    layers = [(7, 7, input_dim, dim, 1, 3)]
    d = dim
    for _ in range(2):
        layers.append((4, 4, d, 2 * d, 2, 1))
        d *= 2
    for _ in range(n_downsample - 2):
        layers.append((4, 4, d, d, 2, 1))
    params = {"convs": []}
    for (kh, kw, cin, cout, s, p) in layers:
        key, kw_key, kb_key = jax.random.split(key, 3)
        bound = 1.0 / float(kh * kw * cin) ** 0.5
        w = jax.random.uniform(kw_key, (kh, kw, cin, cout), dtype, -bound, bound)
        b = jax.random.uniform(kb_key, (cout,), dtype, -bound, bound)
        params["convs"].append({"w": w, "b": b, "stride": s, "pad": p})
    key, kw_key, kb_key = jax.random.split(key, 3)
    bound = 1.0 / float(d) ** 0.5
    params["head_w"] = jax.random.uniform(kw_key, (d, style_dim), dtype, -bound, bound)
    params["head_b"] = jax.random.uniform(kb_key, (style_dim,), dtype, -bound, bound)
    return params


def style_encoder_forward(x_nchw, params, pad_type="reflect"):
    """Matches StyleEncoder.forward: returns (B, style_dim, 1, 1)."""
    x = jnp.transpose(x_nchw, (0, 2, 3, 1))       # NHWC: channels on the lane axis
    for layer in params["convs"]:
        x = _conv_block(x, layer["w"], layer["b"], stride=layer["stride"],
                        pad=layer["pad"], pad_type=pad_type, apply_relu=True)
    B, H, W_, C = x.shape
    out = _pool_head(x.reshape(B, H * W_, C), params["head_w"], params["head_b"])
    style_dim = params["head_w"].shape[1]
    return out.reshape(B, style_dim, 1, 1)


def style_encoder_reference(x_nchw, params, pad_type="reflect"):
    """Plain-JAX f32 reference with identical semantics (XLA convs)."""
    x = jnp.transpose(x_nchw, (0, 2, 3, 1)).astype(jnp.float32)
    for layer in params["convs"]:
        xp = _pad_spatial(x, layer["pad"], pad_type)
        y = lax.conv_general_dilated(
            xp, layer["w"].astype(jnp.float32),
            window_strides=(layer["stride"], layer["stride"]),
            padding="VALID",
            dimension_numbers=("NHWC", "HWIO", "NHWC"))
        x = jnp.maximum(y + layer["b"].astype(jnp.float32), 0.0)
    pooled = x.mean(axis=(1, 2))
    out = pooled @ params["head_w"].astype(jnp.float32) + params["head_b"].astype(jnp.float32)
    return out.reshape(x.shape[0], -1, 1, 1)


if __name__ == "__main__":
    # Small StyleEncoder config: n_downsample=2, input_dim=4, dim=8, style_dim=8,
    # norm='none', activ='relu', pad_type='reflect'.  Input (B, C, H, W) = (2, 4, 16, 16).
    B, C, H, W = 2, 4, 16, 16
    n_downsample, dim, style_dim = 2, 8, 8

    key = jax.random.PRNGKey(0)
    key, kx = jax.random.split(key)
    x = jax.random.normal(kx, (B, C, H, W), dtype=jnp.float32)

    params = init_style_encoder_params(key, n_downsample, C, dim, style_dim)

    out = style_encoder_forward(x, params)
    out = jax.block_until_ready(out)

    ref = style_encoder_reference(x, params)
    assert out.shape == (B, style_dim, 1, 1), out.shape
    # bf16 MXU operands (f32 accumulate) => slightly loosened tolerance vs f32 reference.
    assert jnp.allclose(out, ref, atol=2e-2, rtol=2e-2), (
        "mismatch vs reference, max abs diff = %g" % float(jnp.max(jnp.abs(out - ref))))

    print("KERNEL_OK")
</pallas_src>

<mosaic_0001>
module attributes {stable_mosaic.version = 11 : i64} {
  func.func @_gemm_bias_act_kernel(%arg0: i32, %arg1: memref<256x256xf32, #tpu.memory_space<vmem>>, %arg2: memref<256x128xf32, #tpu.memory_space<vmem>>, %arg3: memref<1x128xf32, #tpu.memory_space<vmem>>, %arg4: memref<256x128xf32, #tpu.memory_space<vmem>>) attributes {dimension_semantics = [#tpu.dimension_semantics<parallel>], iteration_bounds = array<i64: 2>, scalar_prefetch = 0 : i64, scratch_operands = 0 : i64, tpu.core_type = #tpu.core_type<tc>, window_params = [{transform_indices = @transform_0, window_bounds = array<i64: 256, 256>}, {pipeline_mode = #tpu.pipeline_mode<synchronous>, transform_indices = @transform_1, window_bounds = array<i64: 256, 128>}, {pipeline_mode = #tpu.pipeline_mode<synchronous>, transform_indices = @transform_2, window_bounds = array<i64: 1, 128>}, {transform_indices = @transform_3, window_bounds = array<i64: 256, 128>}]} {
    %c0 = arith.constant 0 : index
    %c0_0 = arith.constant 0 : index
    %0 = vector.load %arg1[%c0, %c0_0] : memref<256x256xf32, #tpu.memory_space<vmem>>, vector<256x256xf32>
    %1 = arith.truncf %0 : vector<256x256xf32> to vector<256x256xbf16>
    %c0_1 = arith.constant 0 : index
    %c0_2 = arith.constant 0 : index
    %2 = vector.load %arg2[%c0_1, %c0_2] : memref<256x128xf32, #tpu.memory_space<vmem>>, vector<256x128xf32>
    %3 = arith.truncf %2 : vector<256x128xf32> to vector<256x128xbf16>
    %cst = arith.constant dense<0.000000e+00> : vector<256x128xf32>
    %4 = tpu.matmul %1, %3, %cst {dimension_numbers = #tpu.dot_dimension_numbers<[1], [0], [0], [1], [0, 0, 1, 1], [], []>} : vector<256x256xbf16>, vector<256x128xbf16>, vector<256x128xf32> -> vector<256x128xf32>
    %c0_3 = arith.constant 0 : index
    %c0_4 = arith.constant 0 : index
    %5 = vector.load %arg3[%c0_3, %c0_4] : memref<1x128xf32, #tpu.memory_space<vmem>>, vector<1x128xf32>
    %6 = vector.broadcast %5 : vector<1x128xf32> to vector<256x128xf32>
    %7 = arith.addf %4, %6 : vector<256x128xf32>
    %cst_5 = arith.constant 0.000000e+00 : f32
    %8 = vector.broadcast %cst_5 : f32 to vector<256x128xf32>
    %9 = arith.maximumf %7, %8 : vector<256x128xf32>
    %c0_6 = arith.constant 0 : index
    %c0_7 = arith.constant 0 : index
    %10 = vector.load %arg4[%c0_6, %c0_7] : memref<256x128xf32, #tpu.memory_space<vmem>>, vector<256x128xf32>
    tpu.vector_store %arg4[%c0_6, %c0_7], %9 {strides = array<i32>} : memref<256x128xf32, #tpu.memory_space<vmem>>, vector<256x128xf32>,
    return
  }
  func.func @transform_0(%arg0: i32) -> (i32, i32) {
    %c0_i32 = arith.constant 0 : i32
    %c0_i32_0 = arith.constant 0 : i32
    return %arg0, %c0_i32 : i32, i32
  }
  func.func @transform_1(%arg0: i32) -> (i32, i32) {
    %c0_i32 = arith.constant 0 : i32
    %c0_i32_0 = arith.constant 0 : i32
    %c0_i32_1 = arith.constant 0 : i32
    return %c0_i32, %c0_i32_0 : i32, i32
  }
  func.func @transform_2(%arg0: i32) -> (i32, i32) {
    %c0_i32 = arith.constant 0 : i32
    %c0_i32_0 = arith.constant 0 : i32
    %c0_i32_1 = arith.constant 0 : i32
    return %c0_i32, %c0_i32_0 : i32, i32
  }
  func.func @transform_3(%arg0: i32) -> (i32, i32) {
    %c0_i32 = arith.constant 0 : i32
    %c0_i32_0 = arith.constant 0 : i32
    return %arg0, %c0_i32 : i32, i32
  }
}

</mosaic_0001>

<bundles_post_ra>
// kernel: tpu_custom_call.1
= control target key start
LH: loop header
LB: loop body
LE: loop exit
PB: predicated region body
PF: predicated region fallthrough
CT: control target
= control target key end

     0   :  { %8 = vsyncpa [#allocation3], 0  ;;  %s1238_s0 = inlined_call_operand.hbm [shape: f32[512,256], index: 0, kind: input, shape index: {}]   ;;  %s1239_s1 = inlined_call_operand.hbm [shape: f32[256,128], index: 1, kind: input, shape index: {}]   ;;  %s1240_s2 = inlined_call_operand.vmem [shape: f32[1,128], index: 2, kind: input, shape index: {}]   ;;  %s1241_s3 = inlined_call_operand.hbm [shape: f32[512,128], index: 3, kind: output, shape index: {}]  }
   0x1   :  { %10 = vsyncpa [#allocation3 + $0x1], 0 }
   0x2   :  { %11 = vsyncpa [#allocation6], 0 }
   0x3   :  { %12 = vsyncpa [#allocation4], 0 }
   0x4   :  { %14 = vsyncpa [#allocation4 + $0x1], 0  ;;  %s959_s12 = smov 0   ;;  %s961_s13 = smov 0  }
   0x5   :  { %s963_s14 = smov 0   ;;  %s965_s15 = smov 0  }
   0x6 LB: > { %s980_s16 = sadd.s32 4294967295, %s930_s15   ;;  %s700_s17 = sadd.s32 4294967294, %s930_s15   ;;  %s930_s15 = sphi %s965_s15, %s1251_s15   ;;  %s926_s14 = sphi %s963_s14, %s1250_s14   ;;  %s922_s13 = sphi %s961_s13, %s1249_s13   ;;  %s918_s12 = sphi %s959_s12, %s1248_s12  }
   0x7   : > { %p40_p0 = scmp.ne.s32.totalorder %s922_s13, %s918_s12  ;;  %p41_p1 = scmp.eq.s32.totalorder %s980_s16, 0 }
   0x8   : > { %p106_p2 = scmp.eq.s32.totalorder %s980_s16, 1  ;;  %p112_p3 = scmp.eq.s32.totalorder %s700_s17, 1 }
   0x9   : > { %p989_p4 = por %p41_p1, %p40_p0  ;;  %p701_p5 = scmp.ge.s32.totalorder %s930_s15, 1 }
   0xa   : > { %p994_p6 = por %p112_p3, %p40_p0  ;;  %p119_p7 = scmp.lt.s32.totalorder %s930_s15, 3 }
   0xb   : > { %s130_s22 = sshll.u32 %s1239_s1, 4  ;;  %s932_s24 = smov [#allocation5]   ;;  %s131_s22 = int_to_ptr.hbm [resolvable:$true] %s130_s22 }
   0xc   : > { %p1002_p8 = pnand %p701_p5, %p119_p7  ;;  %s132_s25 = sshll.u32 %s932_s24, 4  ;;  %s133_s25 = int_to_ptr.vmem [resolvable:$true] %s132_s25 }
   0xd   : > { %s1012_s26 = sadd.s32 1, %s930_s15   ;;  %s933_s27 = smov 128  }
   0xe   : > { %p744_p9 = pneg %p1002_p8  ;;  %s934_s28 = smov 8  }
   0xf   : > { %s24_s29 = ssub.s32 %s930_s15, %s1012_s26  ;;  %s27_s30 = sadd.s32 1, %s926_s14 }
  0x10   : > { %p745_p10 = pnand %p744_p9, %p41_p1  ;;  %p25_p12 = scmp.eq.s32.totalorder %s24_s29, 0 }
  0x11   : > { %p34_p13 = scmp.ne.s32.totalorder %s926_s14, %s922_s13  ;;  %p35_p0 = scmp.eq.s32.totalorder %s930_s15, 0 }
  0x12   : > { %747 = dma.hbm_to_vmem [thread:$0]  (!%p745_p10), %s131_s22, 4096, %s133_s25, [#allocation6], %s933_s27, %s933_s27, %s934_s28  }
  0x13   : > { %p757_p3 = scmp.lt.s32.totalorder %s930_s15, 2  ;;  %p36_p5 = por %p35_p0, %p34_p13 }
  0x14   : > { %s1022_s4 = scalar_select %p25_p12, %s926_s14, %s27_s30  }
  0x15   : > { %p1026_p7 = por %p106_p2, %p34_p13  ;;  %s149_s6 = sand.u32 1, %s926_s14  }
  0x16   : > { %s718_s7 = sshll.u32 %s930_s15, 9  ;;  %s704_s8 = sshll.u32 %s149_s6, 9 }
  0x17   : > { %s159_s11 = scalar_lea.hbm %s1238_s0, %s718_s7  ;;  %s153_s20 = scalar_lea.vmem [#allocation2], %s704_s8 }
  0x18   : > { %s160_s17 = sshll.u32 %s159_s11, 4  ;;  %s162_s21 = sshll.u32 %s153_s20, 4  ;;  %s161_s17 = int_to_ptr.hbm [resolvable:$true] %s160_s17  ;;  %s163_s21 = int_to_ptr.vmem [resolvable:$true] %s162_s21 }
  0x19   : > { %p1037_p9 = pnand %p757_p3, %p36_p5  ;;  %s150_s24 = scalar_lea.sflag [#allocation3], %s149_s6 }
  0x1a   : > { %s830_s25 = sshra.s32 %s161_s17, 4  ;;  %s837_s30 = scalar_lea.hbm %s1238_s0, 1024  ;;  %s831_s25 = int_to_ptr.hbm [resolvable:$true] %s830_s25 }
  0x1b   : > { %s832_s27 = scalar_lea.hbm %s831_s25, 512  ;;  %p834_p10 = pneg %p1037_p9 }
  0x1c   : > { %p833_p2 = scmp.ne.s32.totalorder %s831_s25, %s832_s27  ;;  %p838_p0 = scmp.lt.s32.totalorder %s831_s25, %s1238_s0 }
  0x1d   : > { %p839_p3 = scmp.lt.s32.totalorder %s837_s30, %s832_s27 }
  0x1e   : > { %p835_p12 = pnand %p834_p10, %p833_p2 }
  0x1f   : > { %p840_p5 = por %p839_p3, %p838_p0 }
  0x20   : > { %p836_p13 = pneg %p835_p12 }
  0x22   : > { %p841_p11 = pnand %p840_p5, %p836_p13 }
  0x24   : > { %844 = shalt.err (!%p841_p11)
}
  0x25   : > { %s935_s6 = smov 256   ;;  %s936_s9 = smov 16  }
  0x26   : > { %751 = dma.hbm_to_vmem [thread:$0]  (!%p1037_p9), %s161_s17, 8192, %s163_s21, %s150_s24, %s935_s6, %s935_s6, %s936_s9  }
  0x27   : > { %174 = sbr.rel (%p1002_p8) target bundleno = 343 (0x157), region = 32  ;;  %s1054_s10 = sand.u32 (!%p1002_p8), 1, %s922_s13  }
  0x28   : > { %s709_s11 = sshll.u32 (!%p1002_p8), %s1054_s10, 9  ;;  %s177_s20 = scalar_lea.sflag (!%p1002_p8), [#allocation3], %s1054_s10 }
  0x29   : > { %s1058_s25 = scalar_lea.vmem (!%p1002_p8), [#allocation2], %s709_s11 }
  0x2c   : > { %905 = dma.done.wait (%p989_p4), %s177_s20, 8192  }
  0x2d   : > { %907 = vsyncadd (%p989_p4), %s177_s20, 4294959104 }
  0x2e   : > { %909 = dma.done.wait (%p41_p1), [#allocation6], 4096  }
  0x2f   : > { %911 = vsyncadd (%p41_p1), [#allocation6], 4294963200  ;;  %v321_v0 = vld [vmem:[#allocation5 + $0x70] sm:$0xff]  ;;  %v322_v1 = vld [vmem:[#allocation5 + $0x78] sm:$0xff]  ;;  %s711_s17 = sshll.u32 %s1054_s10, 8  ;;  %s719_s22 = sshll.u32 %s980_s16, 8 }
  0x30   : > { %v337_v2 = vld [vmem:[#allocation5 + $0xf0] sm:$0xff]  ;;  %v346_v3 = vpack.c.bf16 %v322_v1, %v321_v0  ;;  %v338_v4 = vld [vmem:[#allocation5 + $0xf8] sm:$0xff]  ;;  %v319_v5 = vld [vmem:[#allocation5 + $0x60] sm:$0xff]  ;;  %s1139_s21 = scalar_lea.vmem [#allocation7], %s711_s17  ;;  %s613_s28 = scalar_lea.hbm %s1241_s3, %s719_s22 }
  0x31   : > { %v320_v6 = vld [vmem:[#allocation5 + $0x68] sm:$0xff]  ;;  %v354_v7 = vpack.c.bf16 %v338_v4, %v337_v2  ;;  %v335_v8 = vld [vmem:[#allocation5 + $0xe0] sm:$0xff]  ;;  %v317_v12 = vld [vmem:[#allocation5 + $0x50] sm:$0xff]  ;;  %s614_s29 = sshll.u32 %s1139_s21, 4  ;;  %s616_s30 = sshll.u32 %s613_s28, 4  ;;  %s615_s29 = int_to_ptr.vmem [resolvable:$true] %s614_s29  ;;  %s617_s30 = int_to_ptr.hbm [resolvable:$true] %s616_s30 }
  0x32   : > { %v336_v9 = vld [vmem:[#allocation5 + $0xe8] sm:$0xff]  ;;  %359 = vmatpush.bf16.msra.mxu0 %v346_v3  ;;  %720 = vmatpush.bf16.msra.mxu2 %v346_v3  ;;  %v345_v10 = vpack.c.bf16 %v320_v6, %v319_v5  ;;  %v318_v13 = vld [vmem:[#allocation5 + $0x58] sm:$0xff]  ;;  %v333_v14 = vld [vmem:[#allocation5 + $0xd0] sm:$0xff]  ;;  %s602_s16 = scalar_lea.sflag [#allocation4], %s1054_s10  ;;  %s874_s7 = sshra.s32 %s617_s30, 4  ;;  %s875_s7 = int_to_ptr.hbm [resolvable:$true] %s874_s7 }
  0x33   : > { %448 = vmatpush.bf16.msra.mxu1 %v354_v7  ;;  %728 = vmatpush.bf16.msra.mxu3 %v354_v7  ;;  %v353_v11 = vpack.c.bf16 %v336_v9, %v335_v8  ;;  %v334_v15 = vld [vmem:[#allocation5 + $0xd8] sm:$0xff]  ;;  %v344_v16 = vpack.c.bf16 %v318_v13, %v317_v12  ;;  %v315_v18 = vld [vmem:[#allocation5 + $0x40] sm:$0xff]  ;;  %v316_v19 = vld [vmem:[#allocation5 + $0x48] sm:$0xff]  ;;  %s876_s8 = scalar_lea.hbm %s875_s7, 256  ;;  %s880_s11 = scalar_lea.hbm %s1241_s3, 512 }
  0x34   : > { %v352_v17 = vpack.c.bf16 %v334_v15, %v333_v14  ;;  %v331_v20 = vld [vmem:[#allocation5 + $0xc0] sm:$0xff]  ;;  %v332_v21 = vld [vmem:[#allocation5 + $0xc8] sm:$0xff]  ;;  %v343_v22 = vpack.c.bf16 %v316_v19, %v315_v18  ;;  %v313_v24 = vld [vmem:[#allocation5 + $0x30] sm:$0xff]  ;;  %p877_p1 = scmp.ne.s32.totalorder %s875_s7, %s876_s8  ;;  %p881_p11 = scmp.lt.s32.totalorder %s875_s7, %s1241_s3 }
  0x35   : > { %v351_v23 = vpack.c.bf16 %v332_v21, %v331_v20  ;;  %v314_v25 = vld [vmem:[#allocation5 + $0x38] sm:$0xff]  ;;  %v329_v26 = vld [vmem:[#allocation5 + $0xb0] sm:$0xff]  ;;  %v311_v30 = vld [vmem:[#allocation5 + $0x20] sm:$0xff]  ;;  %p882_p9 = scmp.lt.s32.totalorder %s880_s11, %s876_s8 }
  0x36   : > { %360 = vmatpush.bf16.msra.mxu0 %v345_v10  ;;  %721 = vmatpush.bf16.msra.mxu2 %v345_v10  ;;  %v330_v27 = vld [vmem:[#allocation5 + $0xb8] sm:$0xff]  ;;  %v342_v28 = vpack.c.bf16 %v314_v25, %v313_v24  ;;  %v312_v31 = vld [vmem:[#allocation5 + $0x28] sm:$0xff]  ;;  %v327_v32 = vld [vmem:[#allocation5 + $0xa0] sm:$0xff]  ;;  %p878_p4 = pnand %p877_p1, %p1026_p7 }
  0x37   : > { %449 = vmatpush.bf16.msra.mxu1 %v353_v11  ;;  %729 = vmatpush.bf16.msra.mxu3 %v353_v11  ;;  %v350_v29 = vpack.c.bf16 %v330_v27, %v329_v26  ;;  %v328_v33 = vld [vmem:[#allocation5 + $0xa8] sm:$0xff]  ;;  %v341_v34 = vpack.c.bf16 %v312_v31, %v311_v30  ;;  %v309_v36 = vld [vmem:[#allocation5 + $0x10] sm:$0xff]  ;;  %v310_v37 = vld [vmem:[#allocation5 + $0x18] sm:$0xff]  ;;  %p883_p2 = por %p882_p9, %p881_p11 }
  0x38   : > { %v349_v35 = vpack.c.bf16 %v328_v33, %v327_v32  ;;  %v325_v38 = vld [vmem:[#allocation5 + $0x90] sm:$0xff]  ;;  %v326_v39 = vld [vmem:[#allocation5 + $0x98] sm:$0xff]  ;;  %v340_v40 = vpack.c.bf16 %v310_v37, %v309_v36  ;;  %v307_v42 = vld [vmem:[#allocation5] sm:$0xff]  ;;  %p879_p8 = pneg %p878_p4 }
  0x39   : > { %v348_v41 = vpack.c.bf16 %v326_v39, %v325_v38  ;;  %v308_v43 = vld [vmem:[#allocation5 + $0x8] sm:$0xff]  ;;  %v323_v44 = vld [vmem:[#allocation5 + $0x80] sm:$0xff]  ;;  %v213_v47 = vld [vmem:[%s1058_s25 + $0x10] sm:$0xff] }
  0x3a   : > { %361 = vmatpush.bf16.msra.mxu0 %v344_v16  ;;  %722 = vmatpush.bf16.msra.mxu2 %v344_v16  ;;  %v324_v45 = vld [vmem:[#allocation5 + $0x88] sm:$0xff]  ;;  %v211_v46 = vld [vmem:[%s1058_s25] sm:$0xff]  ;;  %v339_v48 = vpack.c.bf16 %v308_v43, %v307_v42  ;;  %v245_v50 = vld [vmem:[%s1058_s25 + $0x110] sm:$0xff]  ;;  %p884_p10 = pnand %p883_p2, %p879_p8 }
  0x3b   : > { %450 = vmatpush.bf16.msra.mxu1 %v352_v17  ;;  %730 = vmatpush.bf16.msra.mxu3 %v352_v17  ;;  %v243_v49 = vld [vmem:[%s1058_s25 + $0x100] sm:$0xff]  ;;  %v212_v51 = vld [vmem:[%s1058_s25 + $0x8] sm:$0xff]  ;;  %v347_v52 = vpack.c.bf16 %v324_v45, %v323_v44  ;;  %v214_v53 = vld [vmem:[%s1058_s25 + $0x18] sm:$0xff]  ;;  %v275_v56 = vpack.c.bf16 %v213_v47, %v211_v46 }
  0x3c   : > { %v244_v54 = vld [vmem:[%s1058_s25 + $0x108] sm:$0xff]  ;;  %v246_v55 = vld [vmem:[%s1058_s25 + $0x118] sm:$0xff]  ;;  %v291_v57 = vpack.c.bf16 %v245_v50, %v243_v49  ;;  %v276_v58 = vpack.c.bf16 %v214_v53, %v212_v51  ;;  %v215_v60 = vld [vmem:[%s1058_s25 + $0x20] sm:$0xff] }
  0x3d   : > { %v292_v59 = vpack.c.bf16 %v246_v55, %v244_v54  ;;  %v217_v61 = vld [vmem:[%s1058_s25 + $0x30] sm:$0xff]  ;;  %v247_v62 = vld [vmem:[%s1058_s25 + $0x120] sm:$0xff]  ;;  %v216_v0 = vld [vmem:[%s1058_s25 + $0x28] sm:$0xff] }
  0x3e   : > { %362 = vmatpush.bf16.msra.mxu0 %v343_v22  ;;  %723 = vmatpush.bf16.msra.mxu2 %v343_v22  ;;  %v249_v63 = vld [vmem:[%s1058_s25 + $0x130] sm:$0xff]  ;;  %v218_v1 = vld [vmem:[%s1058_s25 + $0x38] sm:$0xff]  ;;  %v248_v2 = vld [vmem:[%s1058_s25 + $0x128] sm:$0xff]  ;;  %v277_v4 = vpack.c.bf16 %v217_v61, %v215_v60 }
  0x3f   : > { %451 = vmatpush.bf16.msra.mxu1 %v351_v23  ;;  %731 = vmatpush.bf16.msra.mxu3 %v351_v23  ;;  %v250_v3 = vld [vmem:[%s1058_s25 + $0x138] sm:$0xff]  ;;  %v293_v5 = vpack.c.bf16 %v249_v63, %v247_v62  ;;  %v278_v6 = vpack.c.bf16 %v218_v1, %v216_v0  ;;  %v219_v8 = vld [vmem:[%s1058_s25 + $0x40] sm:$0xff]  ;;  %v221_v9 = vld [vmem:[%s1058_s25 + $0x50] sm:$0xff] }
  0x40   : > { %v294_v7 = vpack.c.bf16 %v250_v3, %v248_v2  ;;  %v251_v10 = vld [vmem:[%s1058_s25 + $0x140] sm:$0xff]  ;;  %v253_v11 = vld [vmem:[%s1058_s25 + $0x150] sm:$0xff]  ;;  %v220_v12 = vld [vmem:[%s1058_s25 + $0x48] sm:$0xff]  ;;  %v279_v16 = vpack.c.bf16 %v221_v9, %v219_v8 }
  0x41   : > { %v222_v13 = vld [vmem:[%s1058_s25 + $0x58] sm:$0xff]  ;;  %v252_v14 = vld [vmem:[%s1058_s25 + $0x148] sm:$0xff]  ;;  %v295_v17 = vpack.c.bf16 %v253_v11, %v251_v10  ;;  %v223_v20 = vld [vmem:[%s1058_s25 + $0x60] sm:$0xff] }
  0x42   : > { %363 = vmatpush.bf16.msra.mxu0 %v342_v28  ;;  %724 = vmatpush.bf16.msra.mxu2 %v342_v28  ;;  %v254_v15 = vld [vmem:[%s1058_s25 + $0x158] sm:$0xff]  ;;  %v280_v18 = vpack.c.bf16 %v222_v13, %v220_v12  ;;  %v225_v21 = vld [vmem:[%s1058_s25 + $0x70] sm:$0xff]  ;;  %v255_v22 = vld [vmem:[%s1058_s25 + $0x160] sm:$0xff] }
  0x43   : > { %452 = vmatpush.bf16.msra.mxu1 %v350_v29  ;;  %732 = vmatpush.bf16.msra.mxu3 %v350_v29  ;;  %v296_v19 = vpack.c.bf16 %v254_v15, %v252_v14  ;;  %v257_v23 = vld [vmem:[%s1058_s25 + $0x170] sm:$0xff]  ;;  %v224_v24 = vld [vmem:[%s1058_s25 + $0x68] sm:$0xff]  ;;  %v226_v25 = vld [vmem:[%s1058_s25 + $0x78] sm:$0xff]  ;;  %v281_v28 = vpack.c.bf16 %v225_v21, %v223_v20 }
  0x44   : > { %v256_v26 = vld [vmem:[%s1058_s25 + $0x168] sm:$0xff]  ;;  %v258_v27 = vld [vmem:[%s1058_s25 + $0x178] sm:$0xff]  ;;  %v297_v29 = vpack.c.bf16 %v257_v23, %v255_v22  ;;  %v282_v30 = vpack.c.bf16 %v226_v25, %v224_v24  ;;  %v227_v32 = vld [vmem:[%s1058_s25 + $0x80] sm:$0xff] }
  0x45   : > { %v298_v31 = vpack.c.bf16 %v258_v27, %v256_v26  ;;  %v229_v33 = vld [vmem:[%s1058_s25 + $0x90] sm:$0xff]  ;;  %v228_v36 = vld [vmem:[%s1058_s25 + $0x88] sm:$0xff]  ;;  %v230_v37 = vld [vmem:[%s1058_s25 + $0x98] sm:$0xff] }
  0x46   : > { %364 = vmatpush.bf16.msra.mxu0 %v341_v34  ;;  %725 = vmatpush.bf16.msra.mxu2 %v341_v34  ;;  %v259_v34 = vld [vmem:[%s1058_s25 + $0x180] sm:$0xff]  ;;  %v260_v38 = vld [vmem:[%s1058_s25 + $0x188] sm:$0xff]  ;;  %v262_v39 = vld [vmem:[%s1058_s25 + $0x198] sm:$0xff]  ;;  %v284_v42 = vpack.c.bf16 %v230_v37, %v228_v36 }
  0x47   : > { %453 = vmatpush.bf16.msra.mxu1 %v349_v35  ;;  %733 = vmatpush.bf16.msra.mxu3 %v349_v35  ;;  %v261_v35 = vld [vmem:[%s1058_s25 + $0x190] sm:$0xff]  ;;  %v300_v43 = vpack.c.bf16 %v262_v39, %v260_v38  ;;  %v231_v44 = vld [vmem:[%s1058_s25 + $0xa0] sm:$0xff]  ;;  %v234_v49 = vld [vmem:[%s1058_s25 + $0xb8] sm:$0xff] }
  0x48   : > { %v233_v45 = vld [vmem:[%s1058_s25 + $0xb0] sm:$0xff]  ;;  %v263_v46 = vld [vmem:[%s1058_s25 + $0x1a0] sm:$0xff]  ;;  %v264_v50 = vld [vmem:[%s1058_s25 + $0x1a8] sm:$0xff] }
  0x49   : > { %v265_v47 = vld [vmem:[%s1058_s25 + $0x1b0] sm:$0xff]  ;;  %v266_v51 = vld [vmem:[%s1058_s25 + $0x1b8] sm:$0xff]  ;;  %v236_v60 = vld [vmem:[%s1058_s25 + $0xc8] sm:$0xff] }
  0x4a   : > { %365 = vmatpush.bf16.msra.mxu0 %v340_v40  ;;  %726 = vmatpush.bf16.msra.mxu2 %v340_v40  ;;  %v283_v40 = vpack.c.bf16 %v229_v33, %v227_v32  ;;  %v301_v53 = vpack.c.bf16 %v265_v47, %v263_v46  ;;  %v302_v55 = vpack.c.bf16 %v266_v51, %v264_v50  ;;  %v238_v61 = vld [vmem:[%s1058_s25 + $0xd8] sm:$0xff]  ;;  %v268_v62 = vld [vmem:[%s1058_s25 + $0x1c8] sm:$0xff] }
  0x4b   : > { %454 = vmatpush.bf16.msra.mxu1 %v348_v41  ;;  %734 = vmatpush.bf16.msra.mxu3 %v348_v41  ;;  %v299_v41 = vpack.c.bf16 %v261_v35, %v259_v34  ;;  %v270_v63 = vld [vmem:[%s1058_s25 + $0x1d8] sm:$0xff]  ;;  %v288_v2 = vpack.c.bf16 %v238_v61, %v236_v60  ;;  %v240_v8 = vld [vmem:[%s1058_s25 + $0xe8] sm:$0xff] }
  0x4c   : > { %v304_v3 = vpack.c.bf16 %v270_v63, %v268_v62  ;;  %v242_v9 = vld [vmem:[%s1058_s25 + $0xf8] sm:$0xff]  ;;  %v272_v10 = vld [vmem:[%s1058_s25 + $0x1e8] sm:$0xff] }
  0x4d   : > { %v274_v11 = vld [vmem:[%s1058_s25 + $0x1f8] sm:$0xff]  ;;  %v290_v14 = vpack.c.bf16 %v242_v9, %v240_v8 }
  0x4e   : > { %366 = vmatpush.bf16.msra.mxu0 %v339_v48  ;;  %727 = vmatpush.bf16.msra.mxu2 %v339_v48  ;;  %v232_v48 = vld [vmem:[%s1058_s25 + $0xa8] sm:$0xff]  ;;  %v306_v15 = vpack.c.bf16 %v274_v11, %v272_v10 }
  0x4f   : > { %455 = vmatpush.bf16.msra.mxu1 %v347_v52  ;;  %735 = vmatpush.bf16.msra.mxu3 %v347_v52  ;;  %v285_v52 = vpack.c.bf16 %v233_v45, %v231_v44  ;;  %v286_v54 = vpack.c.bf16 %v234_v49, %v232_v48 }
  0x51   : > { %367 = vmatmul.bf16.vlgmr.msra.gmra.mxu0 %v275_v56  ;;  %407 = vmatmul.bf16.vlgmr.msra.gmra.mxu2 %v291_v57  ;;  %v235_v56 = vld [vmem:[%s1058_s25 + $0xc0] sm:$0xff]  ;;  %v237_v57 = vld [vmem:[%s1058_s25 + $0xd0] sm:$0xff] }
  0x52   : > { %456 = vmatmul.bf16.vlgmr.msra.gmra.mxu1 %v276_v58  ;;  %496 = vmatmul.bf16.vlgmr.msra.gmra.mxu3 %v292_v59  ;;  %v267_v58 = vld [vmem:[%s1058_s25 + $0x1c0] sm:$0xff]  ;;  %v269_v59 = vld [vmem:[%s1058_s25 + $0x1d0] sm:$0xff]  ;;  %v287_v0 = vpack.c.bf16 %v237_v57, %v235_v56 }
  0x53   : > { %v303_v1 = vpack.c.bf16 %v269_v59, %v267_v58 }
  0x61   : > { %372 = vmatmul.bf16.gmra.mxu0 %v277_v4  ;;  %412 = vmatmul.bf16.gmra.mxu2 %v293_v5  ;;  %v239_v4 = vld [vmem:[%s1058_s25 + $0xe0] sm:$0xff]  ;;  %v241_v5 = vld [vmem:[%s1058_s25 + $0xf0] sm:$0xff] }
  0x62   : > { %461 = vmatmul.bf16.gmra.mxu1 %v278_v6  ;;  %501 = vmatmul.bf16.gmra.mxu3 %v294_v7  ;;  %v271_v6 = vld [vmem:[%s1058_s25 + $0x1e0] sm:$0xff]  ;;  %v273_v7 = vld [vmem:[%s1058_s25 + $0x1f0] sm:$0xff]  ;;  %v289_v12 = vpack.c.bf16 %v241_v5, %v239_v4 }
  0x63   : > { %v305_v13 = vpack.c.bf16 %v273_v7, %v271_v6 }
  0x71   : > { %377 = vmatmul.bf16.gmra.mxu0 %v279_v16  ;;  %417 = vmatmul.bf16.gmra.mxu2 %v295_v17  ;;  %v1135_v16 = vld [vmem:[%s1240_s2] ss:$0 sm:$0xff] }
  0x72   : > { %466 = vmatmul.bf16.gmra.mxu1 %v280_v18  ;;  %506 = vmatmul.bf16.gmra.mxu3 %v296_v19 }
  0x81   : > { %382 = vmatmul.bf16.gmra.mxu0 %v281_v28  ;;  %422 = vmatmul.bf16.gmra.mxu2 %v297_v29 }
  0x82   : > { %471 = vmatmul.bf16.gmra.mxu1 %v282_v30  ;;  %511 = vmatmul.bf16.gmra.mxu3 %v298_v31 }
  0x91   : > { %387 = vmatmul.bf16.gmra.mxu0 %v283_v40  ;;  %427 = vmatmul.bf16.gmra.mxu2 %v299_v41 }
  0x92   : > { %476 = vmatmul.bf16.gmra.mxu1 %v284_v42  ;;  %516 = vmatmul.bf16.gmra.mxu3 %v300_v43 }
  0xa1   : > { %392 = vmatmul.bf16.gmra.mxu0 %v285_v52  ;;  %432 = vmatmul.bf16.gmra.mxu2 %v301_v53 }
  0xa2   : > { %481 = vmatmul.bf16.gmra.mxu1 %v286_v54  ;;  %521 = vmatmul.bf16.gmra.mxu3 %v302_v55 }
  0xb1   : > { %397 = vmatmul.bf16.gmra.mxu0 %v287_v0  ;;  %437 = vmatmul.bf16.gmra.mxu2 %v303_v1 }
  0xb2   : > { %486 = vmatmul.bf16.gmra.mxu1 %v288_v2  ;;  %526 = vmatmul.bf16.gmra.mxu3 %v304_v3 }
  0xc1   : > { %402 = vmatmul.bf16.gmra.mxu0 %v289_v12  ;;  %442 = vmatmul.bf16.gmra.mxu2 %v305_v13 }
  0xc2   : > { %491 = vmatmul.bf16.gmra.mxu1 %v290_v14  ;;  %531 = vmatmul.bf16.gmra.mxu3 %v306_v15 }
  0xce   : > { %v368_v17 = vpop.f32.mrf.mxu0 }
  0xcf   : > { %v369_v18 = vadd.f32 %v1135_v16, %v368_v17  ;;  %v457_v19 = vpop.f32.mrf.mxu1 }
  0xd1   : > { %v458_v20 = vadd.f32 %v457_v19, %v369_v18 }
  0xd3   : > { %v537_v21 = vmax.f32 %v458_v20, 0.0 }
  0xd4   : > { %v408_v22 = vpop.f32.mrf.mxu2 }
  0xd5   : > { %569 = vst [vmem:[%s1139_s21] sm:$0xff] %v537_v21  ;;  %v409_v23 = vadd.f32 %v1135_v16, %v408_v22  ;;  %v497_v24 = vpop.f32.mrf.mxu3 }
  0xd6   : > { %v370_v25 = vpop.f32.mrf.mxu0 }
  0xd7   : > { %v498_v26 = vadd.f32 %v497_v24, %v409_v23  ;;  %v371_v27 = vadd.f32 %v1135_v16, %v370_v25  ;;  %v459_v28 = vpop.f32.mrf.mxu1 }
  0xd9   : > { %v553_v29 = vmax.f32 %v498_v26, 0.0  ;;  %v460_v30 = vadd.f32 %v459_v28, %v371_v27 }
  0xdb   : > { %585 = vst [vmem:[%s1139_s21 + $0x80] sm:$0xff] %v553_v29  ;;  %v538_v31 = vmax.f32 %v460_v30, 0.0 }
  0xdc   : > { %v410_v32 = vpop.f32.mrf.mxu2 }
  0xdd   : > { %570 = vst [vmem:[%s1139_s21 + $0x8] sm:$0xff] %v538_v31  ;;  %v411_v33 = vadd.f32 %v1135_v16, %v410_v32  ;;  %v499_v34 = vpop.f32.mrf.mxu3 }
  0xde   : > { %v373_v35 = vpop.f32.mrf.mxu0 }
  0xdf   : > { %v500_v36 = vadd.f32 %v499_v34, %v411_v33  ;;  %v374_v37 = vadd.f32 %v1135_v16, %v373_v35  ;;  %v462_v38 = vpop.f32.mrf.mxu1 }
  0xe1   : > { %v554_v39 = vmax.f32 %v500_v36, 0.0  ;;  %v463_v40 = vadd.f32 %v462_v38, %v374_v37 }
  0xe3   : > { %586 = vst [vmem:[%s1139_s21 + $0x88] sm:$0xff] %v554_v39  ;;  %v539_v41 = vmax.f32 %v463_v40, 0.0 }
  0xe4   : > { %v413_v42 = vpop.f32.mrf.mxu2 }
  0xe5   : > { %571 = vst [vmem:[%s1139_s21 + $0x10] sm:$0xff] %v539_v41  ;;  %v414_v43 = vadd.f32 %v1135_v16, %v413_v42  ;;  %v502_v44 = vpop.f32.mrf.mxu3 }
  0xe6   : > { %v375_v45 = vpop.f32.mrf.mxu0 }
  0xe7   : > { %v503_v46 = vadd.f32 %v502_v44, %v414_v43  ;;  %v376_v47 = vadd.f32 %v1135_v16, %v375_v45  ;;  %v464_v48 = vpop.f32.mrf.mxu1 }
  0xe9   : > { %v555_v49 = vmax.f32 %v503_v46, 0.0  ;;  %v465_v50 = vadd.f32 %v464_v48, %v376_v47 }
  0xeb   : > { %587 = vst [vmem:[%s1139_s21 + $0x90] sm:$0xff] %v555_v49  ;;  %v540_v51 = vmax.f32 %v465_v50, 0.0 }
  0xec   : > { %v415_v52 = vpop.f32.mrf.mxu2 }
  0xed   : > { %572 = vst [vmem:[%s1139_s21 + $0x18] sm:$0xff] %v540_v51  ;;  %v416_v53 = vadd.f32 %v1135_v16, %v415_v52  ;;  %v504_v54 = vpop.f32.mrf.mxu3 }
  0xee   : > { %v378_v55 = vpop.f32.mrf.mxu0 }
  0xef   : > { %v505_v56 = vadd.f32 %v504_v54, %v416_v53  ;;  %v379_v57 = vadd.f32 %v1135_v16, %v378_v55  ;;  %v467_v58 = vpop.f32.mrf.mxu1 }
  0xf1   : > { %v556_v59 = vmax.f32 %v505_v56, 0.0  ;;  %v468_v60 = vadd.f32 %v467_v58, %v379_v57 }
  0xf3   : > { %588 = vst [vmem:[%s1139_s21 + $0x98] sm:$0xff] %v556_v59  ;;  %v541_v61 = vmax.f32 %v468_v60, 0.0 }
  0xf4   : > { %v418_v62 = vpop.f32.mrf.mxu2 }
  0xf5   : > { %573 = vst [vmem:[%s1139_s21 + $0x20] sm:$0xff] %v541_v61  ;;  %v419_v63 = vadd.f32 %v1135_v16, %v418_v62  ;;  %v507_v0 = vpop.f32.mrf.mxu3 }
  0xf6   : > { %v380_v1 = vpop.f32.mrf.mxu0 }
  0xf7   : > { %v508_v2 = vadd.f32 %v507_v0, %v419_v63  ;;  %v381_v3 = vadd.f32 %v1135_v16, %v380_v1  ;;  %v469_v4 = vpop.f32.mrf.mxu1 }
  0xf9   : > { %v557_v5 = vmax.f32 %v508_v2, 0.0  ;;  %v470_v6 = vadd.f32 %v469_v4, %v381_v3 }
  0xfb   : > { %589 = vst [vmem:[%s1139_s21 + $0xa0] sm:$0xff] %v557_v5  ;;  %v542_v7 = vmax.f32 %v470_v6, 0.0 }
  0xfc   : > { %v420_v8 = vpop.f32.mrf.mxu2 }
  0xfd   : > { %574 = vst [vmem:[%s1139_s21 + $0x28] sm:$0xff] %v542_v7  ;;  %v421_v9 = vadd.f32 %v1135_v16, %v420_v8  ;;  %v509_v10 = vpop.f32.mrf.mxu3 }
  0xfe   : > { %v383_v11 = vpop.f32.mrf.mxu0 }
  0xff   : > { %v510_v12 = vadd.f32 %v509_v10, %v421_v9  ;;  %v384_v13 = vadd.f32 %v1135_v16, %v383_v11  ;;  %v472_v14 = vpop.f32.mrf.mxu1 }
 0x101   : > { %v558_v15 = vmax.f32 %v510_v12, 0.0  ;;  %v473_v17 = vadd.f32 %v472_v14, %v384_v13 }
 0x103   : > { %590 = vst [vmem:[%s1139_s21 + $0xa8] sm:$0xff] %v558_v15  ;;  %v543_v18 = vmax.f32 %v473_v17, 0.0 }
 0x104   : > { %v423_v19 = vpop.f32.mrf.mxu2 }
 0x105   : > { %575 = vst [vmem:[%s1139_s21 + $0x30] sm:$0xff] %v543_v18  ;;  %v424_v20 = vadd.f32 %v1135_v16, %v423_v19  ;;  %v512_v21 = vpop.f32.mrf.mxu3 }
 0x106   : > { %v385_v22 = vpop.f32.mrf.mxu0 }
 0x107   : > { %v513_v23 = vadd.f32 %v512_v21, %v424_v20  ;;  %v386_v24 = vadd.f32 %v1135_v16, %v385_v22  ;;  %v474_v25 = vpop.f32.mrf.mxu1 }
 0x109   : > { %v559_v26 = vmax.f32 %v513_v23, 0.0  ;;  %v475_v27 = vadd.f32 %v474_v25, %v386_v24 }
 0x10b   : > { %591 = vst [vmem:[%s1139_s21 + $0xb0] sm:$0xff] %v559_v26  ;;  %v544_v28 = vmax.f32 %v475_v27, 0.0 }
 0x10c   : > { %v425_v29 = vpop.f32.mrf.mxu2 }
 0x10d   : > { %576 = vst [vmem:[%s1139_s21 + $0x38] sm:$0xff] %v544_v28  ;;  %v426_v30 = vadd.f32 %v1135_v16, %v425_v29  ;;  %v514_v31 = vpop.f32.mrf.mxu3 }
 0x10e   : > { %v388_v32 = vpop.f32.mrf.mxu0 }
 0x10f   : > { %v515_v33 = vadd.f32 %v514_v31, %v426_v30  ;;  %v389_v34 = vadd.f32 %v1135_v16, %v388_v32  ;;  %v477_v35 = vpop.f32.mrf.mxu1 }
 0x111   : > { %v560_v36 = vmax.f32 %v515_v33, 0.0  ;;  %v478_v37 = vadd.f32 %v477_v35, %v389_v34 }
 0x113   : > { %592 = vst [vmem:[%s1139_s21 + $0xb8] sm:$0xff] %v560_v36  ;;  %v545_v38 = vmax.f32 %v478_v37, 0.0 }
 0x114   : > { %v428_v39 = vpop.f32.mrf.mxu2 }
 0x115   : > { %577 = vst [vmem:[%s1139_s21 + $0x40] sm:$0xff] %v545_v38  ;;  %v429_v40 = vadd.f32 %v1135_v16, %v428_v39  ;;  %v517_v41 = vpop.f32.mrf.mxu3 }
 0x116   : > { %v390_v42 = vpop.f32.mrf.mxu0 }
 0x117   : > { %v518_v43 = vadd.f32 %v517_v41, %v429_v40  ;;  %v391_v44 = vadd.f32 %v1135_v16, %v390_v42  ;;  %v479_v45 = vpop.f32.mrf.mxu1 }
 0x119   : > { %v561_v46 = vmax.f32 %v518_v43, 0.0  ;;  %v480_v47 = vadd.f32 %v479_v45, %v391_v44 }
 0x11b   : > { %593 = vst [vmem:[%s1139_s21 + $0xc0] sm:$0xff] %v561_v46  ;;  %v546_v48 = vmax.f32 %v480_v47, 0.0 }
 0x11c   : > { %v430_v49 = vpop.f32.mrf.mxu2 }
 0x11d   : > { %578 = vst [vmem:[%s1139_s21 + $0x48] sm:$0xff] %v546_v48  ;;  %v431_v50 = vadd.f32 %v1135_v16, %v430_v49  ;;  %v519_v51 = vpop.f32.mrf.mxu3 }
 0x11e   : > { %v393_v52 = vpop.f32.mrf.mxu0 }
 0x11f   : > { %v520_v53 = vadd.f32 %v519_v51, %v431_v50  ;;  %v394_v54 = vadd.f32 %v1135_v16, %v393_v52  ;;  %v482_v55 = vpop.f32.mrf.mxu1 }
 0x121   : > { %v562_v56 = vmax.f32 %v520_v53, 0.0  ;;  %v483_v57 = vadd.f32 %v482_v55, %v394_v54 }
 0x123   : > { %594 = vst [vmem:[%s1139_s21 + $0xc8] sm:$0xff] %v562_v56  ;;  %v547_v58 = vmax.f32 %v483_v57, 0.0 }
 0x124   : > { %v433_v59 = vpop.f32.mrf.mxu2 }
 0x125   : > { %579 = vst [vmem:[%s1139_s21 + $0x50] sm:$0xff] %v547_v58  ;;  %v434_v60 = vadd.f32 %v1135_v16, %v433_v59  ;;  %v522_v61 = vpop.f32.mrf.mxu3 }
 0x126   : > { %v395_v62 = vpop.f32.mrf.mxu0 }
 0x127   : > { %v523_v63 = vadd.f32 %v522_v61, %v434_v60  ;;  %v396_v0 = vadd.f32 %v1135_v16, %v395_v62  ;;  %v484_v1 = vpop.f32.mrf.mxu1 }
 0x129   : > { %v563_v2 = vmax.f32 %v523_v63, 0.0  ;;  %v485_v3 = vadd.f32 %v484_v1, %v396_v0 }
 0x12b   : > { %595 = vst [vmem:[%s1139_s21 + $0xd0] sm:$0xff] %v563_v2  ;;  %v548_v4 = vmax.f32 %v485_v3, 0.0 }
 0x12c   : > { %v435_v5 = vpop.f32.mrf.mxu2 }
 0x12d   : > { %580 = vst [vmem:[%s1139_s21 + $0x58] sm:$0xff] %v548_v4  ;;  %v436_v6 = vadd.f32 %v1135_v16, %v435_v5  ;;  %v524_v7 = vpop.f32.mrf.mxu3 }
 0x12e   : > { %v398_v8 = vpop.f32.mrf.mxu0 }
 0x12f   : > { %v525_v9 = vadd.f32 %v524_v7, %v436_v6  ;;  %v399_v10 = vadd.f32 %v1135_v16, %v398_v8  ;;  %v487_v11 = vpop.f32.mrf.mxu1 }
 0x131   : > { %v564_v12 = vmax.f32 %v525_v9, 0.0  ;;  %v488_v13 = vadd.f32 %v487_v11, %v399_v10 }
 0x133   : > { %596 = vst [vmem:[%s1139_s21 + $0xd8] sm:$0xff] %v564_v12  ;;  %v549_v14 = vmax.f32 %v488_v13, 0.0 }
 0x134   : > { %v438_v15 = vpop.f32.mrf.mxu2 }
 0x135   : > { %581 = vst [vmem:[%s1139_s21 + $0x60] sm:$0xff] %v549_v14  ;;  %v439_v17 = vadd.f32 %v1135_v16, %v438_v15  ;;  %v527_v18 = vpop.f32.mrf.mxu3 }
 0x136   : > { %v400_v19 = vpop.f32.mrf.mxu0 }
 0x137   : > { %v528_v20 = vadd.f32 %v527_v18, %v439_v17  ;;  %v401_v21 = vadd.f32 %v1135_v16, %v400_v19  ;;  %v489_v22 = vpop.f32.mrf.mxu1 }
 0x139   : > { %v565_v23 = vmax.f32 %v528_v20, 0.0  ;;  %v490_v24 = vadd.f32 %v489_v22, %v401_v21 }
 0x13b   : > { %597 = vst [vmem:[%s1139_s21 + $0xe0] sm:$0xff] %v565_v23  ;;  %v550_v25 = vmax.f32 %v490_v24, 0.0 }
 0x13c   : > { %v440_v26 = vpop.f32.mrf.mxu2 }
 0x13d   : > { %582 = vst [vmem:[%s1139_s21 + $0x68] sm:$0xff] %v550_v25  ;;  %v441_v27 = vadd.f32 %v1135_v16, %v440_v26  ;;  %v529_v28 = vpop.f32.mrf.mxu3 }
 0x13e   : > { %v403_v29 = vpop.f32.mrf.mxu0 }
 0x13f   : > { %v530_v30 = vadd.f32 %v529_v28, %v441_v27  ;;  %v404_v31 = vadd.f32 %v1135_v16, %v403_v29  ;;  %v492_v32 = vpop.f32.mrf.mxu1 }
 0x141   : > { %v566_v33 = vmax.f32 %v530_v30, 0.0  ;;  %v493_v34 = vadd.f32 %v492_v32, %v404_v31 }
 0x143   : > { %598 = vst [vmem:[%s1139_s21 + $0xe8] sm:$0xff] %v566_v33  ;;  %v551_v35 = vmax.f32 %v493_v34, 0.0 }
 0x144   : > { %v443_v36 = vpop.f32.mrf.mxu2 }
 0x145   : > { %583 = vst [vmem:[%s1139_s21 + $0x70] sm:$0xff] %v551_v35  ;;  %v444_v37 = vadd.f32 %v1135_v16, %v443_v36  ;;  %v532_v38 = vpop.f32.mrf.mxu3 }
 0x146   : > { %v405_v39 = vpop.f32.mrf.mxu0 }
 0x147   : > { %v533_v40 = vadd.f32 %v532_v38, %v444_v37  ;;  %v406_v41 = vadd.f32 %v1135_v16, %v405_v39  ;;  %v494_v42 = vpop.f32.mrf.mxu1 }
 0x149   : > { %v567_v43 = vmax.f32 %v533_v40, 0.0  ;;  %v495_v44 = vadd.f32 %v494_v42, %v406_v41 }
 0x14b   : > { %599 = vst [vmem:[%s1139_s21 + $0xf0] sm:$0xff] %v567_v43  ;;  %v552_v45 = vmax.f32 %v495_v44, 0.0 }
 0x14c   : > { %v445_v46 = vpop.f32.mrf.mxu2 }
 0x14d   : > { %584 = vst [vmem:[%s1139_s21 + $0x78] sm:$0xff] %v552_v45  ;;  %v446_v47 = vadd.f32 %v1135_v16, %v445_v46  ;;  %v534_v48 = vpop.f32.mrf.mxu3 }
 0x14f   : > { %v535_v49 = vadd.f32 %v534_v48, %v446_v47 }
 0x151   : > { %v568_v50 = vmax.f32 %v535_v49, 0.0 }
 0x153   : > { %600 = vst [vmem:[%s1139_s21 + $0xf8] sm:$0xff] %v568_v50 }
 0x154   : > { %887 = shalt.err (!%p884_p10)
}
 0x155   : > { %s937_s10 = smov 128   ;;  %s938_s18 = smov 8  }
 0x156   : > { %742 = dma.vmem_to_hbm [thread:$0]  (%p1026_p7), %s615_s29, 4096, %s617_s30, %s602_s16, %s937_s10, %s937_s10, %s938_s18  }
 0x157 PF: > { %s631_s23 = sand.u32 1, %s918_s12   ;;  %p1247_p12 = scmp.ge.s32.totalorder %s930_s15, 2 }
 0x158   : > { %s632_s17 = scalar_lea.sflag [#allocation4], %s631_s23 }
 0x159   : > { %p753_p13 = pnand %p1247_p12, %p994_p6 }
 0x15b   : > { %p754_p0 = pneg %p753_p13 }
 0x15d   : > { %913 = dma.done.wait (%p754_p0), %s632_s17, 4096  }
 0x15e   : > { %915 = vsyncadd (%p754_p0), %s632_s17, 4294963200  ;;  %p17_p3 = scmp.ge.s32.totalorder %s1012_s26, 4   ;;  %s1248_s12 = smov %s922_s13 }
 0x15f   : > { %s1249_s13 = smov %s926_s14  ;;  %s1250_s14 = smov %s1022_s4 }
 0x160   : > { %s1251_s15 = smov %s1012_s26  ;;  %19 = sbr.rel (!%p17_p3) target bundleno = 6 (0x6), region = 81 }
 0x165   :  { %638 = vsyncpa [#allocation3], 1 }
 0x166   :  { %640 = vsyncpa [#allocation3 + $0x1], 1 }
 0x167   :  { %641 = vsyncpa [#allocation6], 1 }
 0x168   :  { %642 = vsyncpa [#allocation4], 1 }
 0x169   :  { %644 = vsyncpa [#allocation4 + $0x1], 1 }

</bundles_post_ra>
